<compile_context>
chip_gen: v7x
topology: tpu7x:2x2x1
jax: 0.10.0
libtpu: 0.0.40
codegen_flags: <defaults>
</compile_context>

<pallas_src>
import jax
import jax.numpy as jnp
from jax.experimental import pallas as pl
from jax.experimental.pallas import tpu as pltpu


def gcn_two_hop_kernel(a_ref, h_ref, o_ref):
    # a_ref: (N, N)  symmetric-normalized (dropped-out) adjacency, bf16
    # h_ref: (N, td) node features; node on sublane axis, feature on lane axis, bf16
    # o_ref: (N, td) output features, f32
    a = a_ref[...]
    h0 = h_ref[...]
    # Hop 1: A @ H   (bf16 x bf16 -> f32 accumulate on the MXU)
    h1 = jnp.dot(a, h0, preferred_element_type=jnp.float32)
    # Hop 2: A @ h1  (re-quantize the intermediate to bf16 for the MXU)
    h2 = jnp.dot(a, h1.astype(jnp.bfloat16), preferred_element_type=jnp.float32)
    # Mean of [h0, h1, h2]; the h0 term stays exact (never re-quantized).
    o_ref[...] = (h0.astype(jnp.float32) + h1 + h2) * (1.0 / 3.0)


def gcn_forward(a_norm, feat, *, td=None):
    """GCN.forward: both GraphConv hops + 3-way mean fused into one Pallas call."""
    N, D = feat.shape
    assert N % 8 == 0, "node count must be sublane-aligned (pad N to a multiple of 8)"
    if td is None:
        td = D                          # single grid step: problem is launch-overhead bound
    # Keep output stores lane-dense (never let the output last dim drop below 128).
    assert D % td == 0 and td % 128 == 0

    a_bf16 = a_norm.astype(jnp.bfloat16)
    h_bf16 = feat.astype(jnp.bfloat16)

    out = pl.pallas_call(
        gcn_two_hop_kernel,
        out_shape=jax.ShapeDtypeStruct((N, D), jnp.float32),
        grid=(D // td,),
        in_specs=[
            pl.BlockSpec((N, N), lambda j: (0, 0)),    # adjacency, resident each step
            pl.BlockSpec((N, td), lambda j: (0, j)),   # feature column tile
        ],
        out_specs=pl.BlockSpec((N, td), lambda j: (0, j)),
        compiler_params=pltpu.CompilerParams(
            dimension_semantics=("parallel",)),        # independent feature tiles
        cost_estimate=pl.CostEstimate(                 # hint so XLA overlaps the call
            flops=4 * N * N * D + 3 * N * D,           # two matmuls + elementwise mean
            transcendentals=0,
            bytes_accessed=2 * N * N + 2 * N * D + 4 * N * D),
    )(a_bf16, h_bf16)
    return out.astype(feat.dtype)


def build_normalized_graph(key, n_nodes, n_edges, dropout_prob=0.7):
    """Glue: synthetic graph + add_self_loop + graph_dropout + 'both' sym-normalization.

    The dropout mask is sampled here (per call), matching training-mode
    re-sampling every forward; since A feeds the kernel directly, no re-fusion
    step is needed when the mask changes.
    """
    k_src, k_dst, k_w, k_drop = jax.random.split(key, 4)
    src = jax.random.randint(k_src, (n_edges,), 0, n_nodes)
    dst = jax.random.randint(k_dst, (n_edges,), 0, n_nodes)
    w = jax.random.uniform(k_w, (n_edges,), dtype=jnp.float32)

    # dgl.add_self_loop: append (i, i) edges, edge weight filled with 1.0
    loop = jnp.arange(n_nodes)
    src = jnp.concatenate([src, loop])
    dst = jnp.concatenate([dst, loop])
    w = jnp.concatenate([w, jnp.ones((n_nodes,), jnp.float32)])
    num_edges = n_edges + n_nodes

    # graph_dropout(g, keep_prob = 1 - dropout_prob): zero randomly-indexed edge weights.
    # Indices drawn WITH replacement (matching torch.randint), so the effective
    # drop fraction is < dropout_prob -- intentional, mirrors the original code.
    keep_prob = 1.0 - dropout_prob
    drop_size = int((1.0 - keep_prob) * num_edges)
    rand_idx = jax.random.randint(k_drop, (drop_size,), 0, num_edges)
    mask = jnp.zeros((num_edges,), dtype=bool).at[rand_idx].set(True)
    w = jnp.where(mask, 0.0, w)

    # GraphConv norm='both' uses UNWEIGHTED in/out degrees (post self-loop; dropout
    # only zeroes weights, edges remain), clamped to >= 1.
    out_deg = jnp.zeros((n_nodes,), jnp.float32).at[src].add(1.0)
    in_deg = jnp.zeros((n_nodes,), jnp.float32).at[dst].add(1.0)
    out_norm = jax.lax.rsqrt(jnp.maximum(out_deg, 1.0))
    in_norm = jax.lax.rsqrt(jnp.maximum(in_deg, 1.0))

    # Dense weighted adjacency: A_w[dst, src] += w  (parallel edges sum, like DGL msg-sum)
    a_w = jnp.zeros((n_nodes, n_nodes), jnp.float32).at[dst, src].add(w)
    a_norm = in_norm[:, None] * a_w * out_norm[None, :]
    return a_norm


if __name__ == "__main__":
    key = jax.random.PRNGKey(0)
    k_graph, k_feat = jax.random.split(key, 2)

    N = 64        # number of graph nodes (do NOT pad to 128/256: MXU is not the bottleneck)
    D = 256       # in_dim == out_dim (GraphConv has weight=False)
    E = 200       # number of random edges before self-loops

    a_norm = build_normalized_graph(k_graph, N, E, dropout_prob=0.7)
    feat = jax.random.normal(k_feat, (N, D), dtype=jnp.float32)

    out = jax.block_until_ready(gcn_forward(a_norm, feat))
    assert out.shape == (N, D) and out.dtype == jnp.float32

    # Check 1 -- kernel correctness at matched precision: same bf16-quantized
    # operands, same two-hop structure, f32 accumulation in plain JAX.
    a_q = a_norm.astype(jnp.bfloat16).astype(jnp.float32)
    h_q = feat.astype(jnp.bfloat16).astype(jnp.float32)
    h1_m = jnp.dot(a_q, h_q, precision=jax.lax.Precision.HIGHEST)
    h2_m = jnp.dot(a_q, h1_m.astype(jnp.bfloat16).astype(jnp.float32),
                   precision=jax.lax.Precision.HIGHEST)
    ref_matched = (h_q + h1_m + h2_m) / 3.0
    assert jnp.allclose(out, ref_matched, rtol=1e-3, atol=1e-3)

    # Check 2 -- semantics vs. the full-f32 two-hop reference (loose tolerance
    # accounts for the bf16 MXU inputs).
    h1 = jnp.dot(a_norm, feat, precision=jax.lax.Precision.HIGHEST)
    h2 = jnp.dot(a_norm, h1, precision=jax.lax.Precision.HIGHEST)
    ref_f32 = (feat + h1 + h2) / 3.0
    assert jnp.allclose(out, ref_f32, rtol=5e-2, atol=5e-2)

    # TODO(synk): the discarded F.dropout(feature, p=0.2) call in the PyTorch
    # forward is a no-op (return value unused), so it is intentionally omitted.
    print("KERNEL_OK")
</pallas_src>

<mosaic_0001>
module attributes {stable_mosaic.version = 11 : i64} {
  func.func @gcn_two_hop_kernel(%arg0: i32, %arg1: memref<64x64xbf16, #tpu.memory_space<vmem>>, %arg2: memref<64x256xbf16, #tpu.memory_space<vmem>>, %arg3: memref<64x256xf32, #tpu.memory_space<vmem>>) attributes {dimension_semantics = [#tpu.dimension_semantics<parallel>], iteration_bounds = array<i64: 1>, scalar_prefetch = 0 : i64, scratch_operands = 0 : i64, tpu.core_type = #tpu.core_type<tc>, window_params = [{pipeline_mode = #tpu.pipeline_mode<synchronous>, transform_indices = @transform_0, window_bounds = array<i64: 64, 64>}, {transform_indices = @transform_1, window_bounds = array<i64: 64, 256>}, {transform_indices = @transform_2, window_bounds = array<i64: 64, 256>}]} {
    %c0 = arith.constant 0 : index
    %c0_0 = arith.constant 0 : index
    %0 = vector.load %arg1[%c0, %c0_0] : memref<64x64xbf16, #tpu.memory_space<vmem>>, vector<64x64xbf16>
    %c0_1 = arith.constant 0 : index
    %c0_2 = arith.constant 0 : index
    %1 = vector.load %arg2[%c0_1, %c0_2] : memref<64x256xbf16, #tpu.memory_space<vmem>>, vector<64x256xbf16>
    %cst = arith.constant dense<0.000000e+00> : vector<64x256xf32>
    %2 = tpu.matmul %0, %1, %cst {dimension_numbers = #tpu.dot_dimension_numbers<[1], [0], [0], [1], [0, 0, 1, 1], [], []>} : vector<64x64xbf16>, vector<64x256xbf16>, vector<64x256xf32> -> vector<64x256xf32>
    %3 = arith.truncf %2 : vector<64x256xf32> to vector<64x256xbf16>
    %cst_3 = arith.constant dense<0.000000e+00> : vector<64x256xf32>
    %4 = tpu.matmul %0, %3, %cst_3 {dimension_numbers = #tpu.dot_dimension_numbers<[1], [0], [0], [1], [0, 0, 1, 1], [], []>} : vector<64x64xbf16>, vector<64x256xbf16>, vector<64x256xf32> -> vector<64x256xf32>
    %5 = arith.extf %1 : vector<64x256xbf16> to vector<64x256xf32>
    %6 = arith.addf %5, %2 : vector<64x256xf32>
    %7 = arith.addf %6, %4 : vector<64x256xf32>
    %cst_4 = arith.constant 0.333333343 : f32
    %8 = vector.broadcast %cst_4 : f32 to vector<64x256xf32>
    %9 = arith.mulf %7, %8 : vector<64x256xf32>
    %c0_5 = arith.constant 0 : index
    %c0_6 = arith.constant 0 : index
    %10 = vector.load %arg3[%c0_5, %c0_6] : memref<64x256xf32, #tpu.memory_space<vmem>>, vector<64x256xf32>
    tpu.vector_store %arg3[%c0_5, %c0_6], %9 {strides = array<i32>} : memref<64x256xf32, #tpu.memory_space<vmem>>, vector<64x256xf32>,
    return
  }
  func.func @transform_0(%arg0: i32) -> (i32, i32) {
    %c0_i32 = arith.constant 0 : i32
    %c0_i32_0 = arith.constant 0 : i32
    %c0_i32_1 = arith.constant 0 : i32
    return %c0_i32, %c0_i32_0 : i32, i32
  }
  func.func @transform_1(%arg0: i32) -> (i32, i32) {
    %c0_i32 = arith.constant 0 : i32
    %c0_i32_0 = arith.constant 0 : i32
    return %c0_i32, %arg0 : i32, i32
  }
  func.func @transform_2(%arg0: i32) -> (i32, i32) {
    %c0_i32 = arith.constant 0 : i32
    %c0_i32_0 = arith.constant 0 : i32
    return %c0_i32, %arg0 : i32, i32
  }
}

</mosaic_0001>

<bundles_post_ra>
// kernel: tpu_custom_call.1
= control target key start
LH: loop header
LB: loop body
LE: loop exit
PB: predicated region body
PF: predicated region fallthrough
CT: control target
= control target key end

     0   :  { %7 = vsyncpa [#allocation3], 0  ;;  %s653_s0 = inlined_call_operand.hbm [shape: bf16[64,64], index: 0, kind: input, shape index: {}]   ;;  %s654_s1 = inlined_call_operand.hbm [shape: bf16[64,256], index: 1, kind: input, shape index: {}]   ;;  %s655_s2 = inlined_call_operand.hbm [shape: f32[64,256], index: 2, kind: output, shape index: {}]  }
   0x1   :  { %8 = vsyncpa [#allocation6], 0 }
   0x2   :  { %9 = vsyncpa [#allocation4], 0  ;;  %s496_s9 = smov [#allocation2]   ;;  %s424_s13 = scalar_lea.hbm %s653_s0, 512 }
   0x3   :  { %s15_s10 = sshll.u32 %s496_s9, 4  ;;  %p425_p0 = scmp.ne.s32.totalorder %s653_s0, %s424_s13  ;;  %s16_s10 = int_to_ptr.vmem [resolvable:$true] %s15_s10 }
   0x4   :  { %p428_p1 = scmp.lt.u32.totalorder %s424_s13, %s653_s0 }
   0x6   :  { %p430_p2 = pnand %p428_p1, %p425_p0 }
   0x8   :  { %433 = shalt.err (!%p430_p2)
}
   0x9   :  { %s434_s18 = scalar_lea.vmem %s16_s10, 512  ;;  %p439_p4 = scmp.lt.s32.totalorder %s16_s10, %s16_s10 }
   0xa   :  { %p435_p3 = scmp.ne.s32.totalorder %s16_s10, %s434_s18  ;;  %p440_p5 = scmp.lt.s32.totalorder %s434_s18, %s434_s18 }
   0xc   :  { %p441_p6 = por %p440_p5, %p439_p4 }
   0xe   :  { %p442_p7 = pnand %p441_p6, %p435_p3 }
  0x10   :  { %445 = shalt.err (!%p442_p7)
}
  0x11   :  { %s497_s19 = smov 64   ;;  %s498_s20 = smov 4  }
  0x12   :  { %21 = dma.hbm_to_vmem [thread:$0]  %s653_s0, 512, %s16_s10, [#allocation3], %s497_s19, %s497_s19, %s498_s20  }
  0x13   :  { %s499_s23 = smov [#allocation5]   ;;  %s446_s27 = scalar_lea.hbm %s654_s1, 1024 }
  0x14   :  { %s27_s24 = sshll.u32 %s499_s23, 4  ;;  %p447_p8 = scmp.ne.s32.totalorder %s654_s1, %s446_s27  ;;  %s28_s24 = int_to_ptr.vmem [resolvable:$true] %s27_s24 }
  0x15   :  { %p450_p9 = scmp.lt.u32.totalorder %s446_s27, %s654_s1 }
  0x17   :  { %p452_p10 = pnand %p450_p9, %p447_p8 }
  0x19   :  { %455 = shalt.err (!%p452_p10)
}
  0x1a   :  { %s456_s4 = scalar_lea.vmem %s28_s24, 1024  ;;  %p461_p12 = scmp.lt.s32.totalorder %s28_s24, %s28_s24 }
  0x1b   :  { %p457_p11 = scmp.ne.s32.totalorder %s28_s24, %s456_s4  ;;  %p462_p13 = scmp.lt.s32.totalorder %s456_s4, %s456_s4 }
  0x1d   :  { %p463_p0 = por %p462_p13, %p461_p12 }
  0x1f   :  { %p464_p1 = pnand %p463_p0, %p457_p11 }
  0x21   :  { %467 = shalt.err (!%p464_p1)
}
  0x22   :  { %s500_s0 = smov 128   ;;  %s501_s5 = smov 8  }
  0x23   :  { %33 = dma.hbm_to_vmem [thread:$0]  %s654_s1, 1024, %s28_s24, [#allocation6], %s500_s0, %s500_s0, %s501_s5  }
  0x24   :  { %490 = dma.done.wait [#allocation3], 512  }
  0x25   :  { %491 = vsyncadd [#allocation3], 4294966784 }
  0x26   :  { %492 = dma.done.wait [#allocation6], 1024  }
  0x27   :  { %493 = vsyncadd [#allocation6], 4294966272  ;;  %v502_v0 = vmov 0   ;;  %v547_v1 = vld [vmem:[#allocation5] sm:$0xff]  ;;  %v549_v2 = vld [vmem:[#allocation5 + $0x8] sm:$0xff]  ;;  %vm117_vm0 = vcmask 523264  }
  0x28   :  { %162 = vmatprep.mubr.bf16.mxu0 %v502_v0  ;;  %243 = vmatprep.mubr.bf16.mxu1 %v502_v0  ;;  %v551_v3 = vld [vmem:[#allocation5 + $0x10] sm:$0xff]  ;;  %v387_v4 = vcombine.high %v547_v1, %v549_v2  ;;  %v386_v5 = vcombine.low %v547_v1, %v549_v2  ;;  %v557_v6 = vld [vmem:[#allocation5 + $0x18] sm:$0xff]  ;;  %v561_v8 = vld [vmem:[#allocation5 + $0x20] sm:$0xff]  ;;  %v284_v45 = vunpack.c.l.bf16 %v547_v1  ;;  %v285_v46 = vunpack.c.h.bf16 %v547_v1  ;;  %s503_s1 = smov [#allocation7]  }
  0x29   :  { %v389_v7 = vcombine.high %v551_v3, %v557_v6  ;;  %v563_v9 = vld [vmem:[#allocation5 + $0x28] sm:$0xff]  ;;  %v388_v10 = vcombine.low %v551_v3, %v557_v6  ;;  %v569_v12 = vld [vmem:[#allocation5 + $0x30] sm:$0xff]  ;;  %v571_v13 = vld [vmem:[#allocation5 + $0x38] sm:$0xff]  ;;  %v286_v47 = vunpack.c.l.bf16 %v549_v2  ;;  %v287_v48 = vunpack.c.h.bf16 %v549_v2  ;;  %s369_s8 = sshll.u32 %s503_s1, 4  ;;  %s370_s8 = int_to_ptr.vmem [resolvable:$true] %s369_s8 }
  0x2a   :  { %130 = vmatprep.subr.bf16.mxu0 %v387_v4  ;;  %v391_v11 = vcombine.high %v561_v8, %v563_v9  ;;  %v390_v14 = vcombine.low %v561_v8, %v563_v9  ;;  %v393_v15 = vcombine.high %v569_v12, %v571_v13  ;;  %v392_v16 = vcombine.low %v569_v12, %v571_v13  ;;  %v420_v17 = vld [vmem:[#allocation2] sm:$0xff]   ;;  %v421_v18 = vld [vmem:[#allocation2 + $0x8] sm:$0xff]   ;;  %v422_v19 = vld [vmem:[#allocation2 + $0x10] sm:$0xff]   ;;  %s468_s9 = scalar_lea.vmem %s370_s8, 2048  ;;  %p473_p3 = scmp.lt.s32.totalorder %s370_s8, %s370_s8 }
  0x2b   :  { %131 = vmatpush1.bf16.msra.mxu0 %v386_v5  ;;  %v423_v20 = vld [vmem:[#allocation2 + $0x18] sm:$0xff]   ;;  %v288_v58 = vunpack.c.l.bf16 %v551_v3  ;;  %v289_v62 = vunpack.c.h.bf16 %v551_v3  ;;  %v290_v1 = vunpack.c.l.bf16 %v557_v6  ;;  %v291_v4 = vunpack.c.h.bf16 %v557_v6  ;;  %p469_p2 = scmp.ne.s32.totalorder %s370_s8, %s468_s9  ;;  %p474_p4 = scmp.lt.s32.totalorder %s468_s9, %s468_s9 }
  0x2c   :  { %132 = vmatprep.subr.bf16.mxu0 %v389_v7  ;;  %v293_v6 = vunpack.c.h.bf16 %v561_v8 }
  0x2d   :  { %p475_p5 = por %p474_p4, %p473_p3 }
  0x2f   :  { %133 = vmatpush1.bf16.msra.mxu0 %v388_v10  ;;  %p476_p6 = pnand %p475_p5, %p469_p2 }
  0x30   :  { %134 = vmatprep.subr.bf16.mxu0 %v391_v11 }
  0x33   :  { %135 = vmatpush1.bf16.msra.mxu0 %v390_v14 }
  0x34   :  { %136 = vmatprep.subr.bf16.mxu0 %v393_v15 }
  0x37   :  { %137 = vmatpush1.bf16.msra.mxu0 %v392_v16 }
  0x3a   :  { %394 = vmatmul.mubr.msk.bf16.vlgmr.msra.gmra.mrb[0].mxu0 %vm117_vm0, %v420_v17 }
  0x3b   :  { %172 = vmatprep.mubr.bf16.mxu0 %v502_v0 }
  0x42   :  { %395 = vmatmul.mubr.msk.bf16.gmra.mrb[4].mxu0 %vm117_vm0, %v421_v18 }
  0x43   :  { %182 = vmatprep.mubr.bf16.mxu0 %v502_v0 }
  0x4a   :  { %396 = vmatmul.mubr.msk.bf16.gmra.mrb[8].mxu0 %vm117_vm0, %v422_v19 }
  0x4b   :  { %192 = vmatprep.mubr.bf16.mxu0 %v502_v0 }
  0x52   :  { %397 = vmatmul.mubr.msk.bf16.gmra.mrb[12].mxu0 %vm117_vm0, %v423_v20 }
 0x10d   :  { %v164_v21 = vpop.f32.mrb[0].mxu0 }
 0x10e   :  { %v166_v22 = vpop.f32.mrb[1].mxu0  ;;  %v300_v49 = vadd.f32 %v284_v45, %v164_v21  ;;  %v296_v45 = vunpack.c.l.bf16 %v569_v12 }
 0x10f   :  { %v168_v23 = vpop.f32.mrb[2].mxu0  ;;  %v301_v50 = vadd.f32 %v285_v46, %v166_v22 }
 0x110   :  { %v170_v24 = vpop.f32.mrb[3].mxu0  ;;  %v203_v25 = vpack.c.bf16 %v168_v23, %v164_v21  ;;  %v302_v52 = vadd.f32 %v286_v47, %v168_v23 }
 0x111   :  { %v204_v26 = vpack.c.bf16 %v170_v24, %v166_v22  ;;  %v303_v55 = vadd.f32 %v287_v48, %v170_v24 }
 0x113   :  { %211 = vmatprep.subr.bf16.mxu1 %v204_v26 }
 0x114   :  { %212 = vmatpush1.bf16.msra.mxu1 %v203_v25  ;;  %v294_v25 = vunpack.c.l.bf16 %v563_v9 }
 0x115   :  { %v174_v27 = vpop.f32.mrb[4].mxu0 }
 0x116   :  { %v176_v28 = vpop.f32.mrb[5].mxu0  ;;  %v304_v7 = vadd.f32 %v288_v58, %v174_v27 }
 0x117   :  { %v178_v29 = vpop.f32.mrb[6].mxu0  ;;  %v305_v10 = vadd.f32 %v289_v62, %v176_v28 }
 0x118   :  { %v205_v30 = vpack.c.bf16 %v178_v29, %v174_v27  ;;  %v180_v31 = vpop.f32.mrb[7].mxu0  ;;  %v306_v14 = vadd.f32 %v290_v1, %v178_v29  ;;  %v295_v27 = vunpack.c.h.bf16 %v563_v9 }
 0x119   :  { %v206_v32 = vpack.c.bf16 %v180_v31, %v176_v28 }
 0x11b   :  { %213 = vmatprep.subr.bf16.mxu1 %v206_v32 }
 0x11c   :  { %214 = vmatpush1.bf16.msra.mxu1 %v205_v30 }
 0x11d   :  { %v586_v33 = vpop.f32.mrb[8].mxu0 }
 0x11e   :  { %v588_v34 = vpop.f32.mrb[9].mxu0 }
 0x11f   :  { %v590_v35 = vpop.f32.mrb[10].mxu0  ;;  %v309_v30 = vadd.f32 %v293_v6, %v588_v34 }
 0x120   :  { %v207_v36 = vpack.c.bf16 %v590_v35, %v586_v33  ;;  %v594_v37 = vpop.f32.mrb[11].mxu0  ;;  %v310_v32 = vadd.f32 %v294_v25, %v590_v35  ;;  %v299_v35 = vunpack.c.h.bf16 %v571_v13 }
 0x121   :  { %v208_v38 = vpack.c.bf16 %v594_v37, %v588_v34  ;;  %v298_v34 = vunpack.c.l.bf16 %v571_v13 }
 0x123   :  { %215 = vmatprep.subr.bf16.mxu1 %v208_v38  ;;  %v311_v38 = vadd.f32 %v295_v27, %v594_v37 }
 0x124   :  { %216 = vmatpush1.bf16.msra.mxu1 %v207_v36 }
 0x125   :  { %v598_v39 = vpop.f32.mrb[12].mxu0 }
 0x126   :  { %v600_v40 = vpop.f32.mrb[13].mxu0  ;;  %v312_v37 = vadd.f32 %v296_v45, %v598_v39 }
 0x127   :  { %v602_v41 = vpop.f32.mrb[14].mxu0 }
 0x128   :  { %v209_v42 = vpack.c.bf16 %v602_v41, %v598_v39  ;;  %v606_v43 = vpop.f32.mrb[15].mxu0 }
 0x129   :  { %v210_v44 = vpack.c.bf16 %v606_v43, %v600_v40 }
 0x12b   :  { %217 = vmatprep.subr.bf16.mxu1 %v210_v44 }
 0x12c   :  { %218 = vmatpush1.bf16.msra.mxu1 %v209_v42 }
 0x12f   :  { %398 = vmatmul.mubr.msk.bf16.vlgmr.msra.gmra.mrb[0].mxu1 %vm117_vm0, %v420_v17  ;;  %v307_v17 = vadd.f32 %v291_v4, %v180_v31 }
 0x130   :  { %253 = vmatprep.mubr.bf16.mxu1 %v502_v0 }
 0x137   :  { %399 = vmatmul.mubr.msk.bf16.gmra.mrb[4].mxu1 %vm117_vm0, %v421_v18 }
 0x138   :  { %263 = vmatprep.mubr.bf16.mxu1 %v502_v0 }
 0x13f   :  { %400 = vmatmul.mubr.msk.bf16.gmra.mrb[8].mxu1 %vm117_vm0, %v422_v19  ;;  %v292_v19 = vunpack.c.l.bf16 %v561_v8 }
 0x140   :  { %273 = vmatprep.mubr.bf16.mxu1 %v502_v0 }
 0x141   :  { %v308_v29 = vadd.f32 %v292_v19, %v586_v33  ;;  %v297_v33 = vunpack.c.h.bf16 %v569_v12 }
 0x147   :  { %401 = vmatmul.mubr.msk.bf16.gmra.mrb[12].mxu1 %vm117_vm0, %v423_v20 }
 0x202   :  { %v245_v51 = vpop.f32.mrb[0].mxu1 }
 0x203   :  { %v316_v53 = vadd.f32 %v300_v49, %v245_v51  ;;  %v247_v54 = vpop.f32.mrb[1].mxu1 }
 0x204   :  { %v317_v56 = vadd.f32 %v301_v50, %v247_v54  ;;  %v249_v57 = vpop.f32.mrb[2].mxu1  ;;  %v314_v54 = vadd.f32 %v298_v34, %v602_v41 }
 0x205   :  { %v332_v59 = vmul.f32 0.33333334, %v316_v53  ;;  %v318_v60 = vadd.f32 %v302_v52, %v249_v57  ;;  %v251_v61 = vpop.f32.mrb[3].mxu1  ;;  %v313_v52 = vadd.f32 %v297_v33, %v600_v40 }
 0x206   :  { %v333_v63 = vmul.f32 0.33333334, %v317_v56  ;;  %v319_v0 = vadd.f32 %v303_v55, %v251_v61  ;;  %v315_v56 = vadd.f32 %v299_v35, %v606_v43 }
 0x207   :  { %348 = vst [vmem:[#allocation7] sm:$0xff] %v332_v59  ;;  %v334_v2 = vmul.f32 0.33333334, %v318_v60 }
 0x208   :  { %349 = vst [vmem:[#allocation7 + $0x8] sm:$0xff] %v333_v63  ;;  %v335_v5 = vmul.f32 0.33333334, %v319_v0 }
 0x209   :  { %350 = vst [vmem:[#allocation7 + $0x10] sm:$0xff] %v334_v2 }
 0x20a   :  { %351 = vst [vmem:[#allocation7 + $0x18] sm:$0xff] %v335_v5  ;;  %v255_v11 = vpop.f32.mrb[4].mxu1 }
 0x20b   :  { %v320_v15 = vadd.f32 %v304_v7, %v255_v11  ;;  %v257_v16 = vpop.f32.mrb[5].mxu1 }
 0x20c   :  { %v321_v3 = vadd.f32 %v305_v10, %v257_v16  ;;  %v259_v18 = vpop.f32.mrb[6].mxu1 }
 0x20d   :  { %v336_v20 = vmul.f32 0.33333334, %v320_v15  ;;  %v322_v21 = vadd.f32 %v306_v14, %v259_v18  ;;  %v261_v22 = vpop.f32.mrb[7].mxu1 }
 0x20e   :  { %v337_v23 = vmul.f32 0.33333334, %v321_v3  ;;  %v323_v24 = vadd.f32 %v307_v17, %v261_v22 }
 0x20f   :  { %352 = vst [vmem:[#allocation7 + $0x20] sm:$0xff] %v336_v20  ;;  %v338_v26 = vmul.f32 0.33333334, %v322_v21 }
 0x210   :  { %353 = vst [vmem:[#allocation7 + $0x28] sm:$0xff] %v337_v23  ;;  %v339_v28 = vmul.f32 0.33333334, %v323_v24 }
 0x211   :  { %354 = vst [vmem:[#allocation7 + $0x30] sm:$0xff] %v338_v26 }
 0x212   :  { %355 = vst [vmem:[#allocation7 + $0x38] sm:$0xff] %v339_v28  ;;  %v265_v31 = vpop.f32.mrb[8].mxu1 }
 0x213   :  { %v324_v8 = vadd.f32 %v308_v29, %v265_v31  ;;  %v267_v36 = vpop.f32.mrb[9].mxu1 }
 0x214   :  { %v325_v42 = vadd.f32 %v309_v30, %v267_v36  ;;  %v269_v44 = vpop.f32.mrb[10].mxu1 }
 0x215   :  { %v340_v9 = vmul.f32 0.33333334, %v324_v8  ;;  %v326_v46 = vadd.f32 %v310_v32, %v269_v44  ;;  %v271_v47 = vpop.f32.mrb[11].mxu1 }
 0x216   :  { %v341_v48 = vmul.f32 0.33333334, %v325_v42  ;;  %v327_v49 = vadd.f32 %v311_v38, %v271_v47 }
 0x217   :  { %356 = vst [vmem:[#allocation7 + $0x40] sm:$0xff] %v340_v9  ;;  %v342_v50 = vmul.f32 0.33333334, %v326_v46 }
 0x218   :  { %357 = vst [vmem:[#allocation7 + $0x48] sm:$0xff] %v341_v48  ;;  %v343_v51 = vmul.f32 0.33333334, %v327_v49 }
 0x219   :  { %358 = vst [vmem:[#allocation7 + $0x50] sm:$0xff] %v342_v50 }
 0x21a   :  { %359 = vst [vmem:[#allocation7 + $0x58] sm:$0xff] %v343_v51  ;;  %v275_v53 = vpop.f32.mrb[12].mxu1 }
 0x21b   :  { %v328_v12 = vadd.f32 %v312_v37, %v275_v53  ;;  %v277_v55 = vpop.f32.mrb[13].mxu1 }
 0x21c   :  { %v329_v57 = vadd.f32 %v313_v52, %v277_v55  ;;  %v279_v58 = vpop.f32.mrb[14].mxu1 }
 0x21d   :  { %v344_v13 = vmul.f32 0.33333334, %v328_v12  ;;  %v330_v59 = vadd.f32 %v314_v54, %v279_v58  ;;  %v281_v60 = vpop.f32.mrb[15].mxu1 }
 0x21e   :  { %v345_v61 = vmul.f32 0.33333334, %v329_v57  ;;  %v331_v39 = vadd.f32 %v315_v56, %v281_v60 }
 0x21f   :  { %360 = vst [vmem:[#allocation7 + $0x60] sm:$0xff] %v344_v13  ;;  %v346_v62 = vmul.f32 0.33333334, %v330_v59 }
 0x220   :  { %361 = vst [vmem:[#allocation7 + $0x68] sm:$0xff] %v345_v61  ;;  %v347_v40 = vmul.f32 0.33333334, %v331_v39 }
 0x221   :  { %362 = vst [vmem:[#allocation7 + $0x70] sm:$0xff] %v346_v62 }
 0x222   :  { %363 = vst [vmem:[#allocation7 + $0x78] sm:$0xff] %v347_v40 }
 0x223   :  { %479 = shalt.err (!%p476_p6)
}
 0x224   :  { %s480_s12 = scalar_lea.hbm %s655_s2, 2048 }
 0x225   :  { %p481_p7 = scmp.ne.s32.totalorder %s655_s2, %s480_s12  ;;  %p484_p8 = scmp.lt.u32.totalorder %s480_s12, %s655_s2 }
 0x227   :  { %p486_p9 = pnand %p484_p8, %p481_p7 }
 0x229   :  { %489 = shalt.err (!%p486_p9)
}
 0x22a   :  { %s504_s17 = smov 256   ;;  %s505_s18 = smov 16  }
 0x22b   :  { %375 = dma.vmem_to_hbm [thread:$0]  %s370_s8, 2048, %s655_s2, [#allocation4], %s504_s17, %s504_s17, %s505_s18  }
 0x22c   :  { %494 = dma.done.wait [#allocation4], 2048  }
 0x22d   :  { %495 = vsyncadd [#allocation4], 4294965248 }
 0x22e   :  { %379 = vsyncpa [#allocation3], 1 }
 0x22f   :  { %380 = vsyncpa [#allocation6], 1 }
 0x230   :  { %381 = vsyncpa [#allocation4], 1 }

</bundles_post_ra>
